<compile_context>
chip_gen: v5e
topology: v5e:2x2
jax: 0.10.0
libtpu: 0.0.40
codegen_flags: <defaults>
</compile_context>

<pallas_src>
import jax
import jax.numpy as jnp
from jax.experimental import pallas as pl
from jax.experimental.pallas import tpu as pltpu


def _mlp_kernel(x_ref, w1_ref, b1_ref, w2_ref, b2_ref, o_ref):
    # h = relu(x @ W1 + b1); y = h @ W2 + b2   (fused, hidden never leaves VMEM)
    # In-kernel cast of x to the weight compute dtype (no wrapper-side HBM pass).
    x = x_ref[...].astype(w1_ref.dtype)
    # First matmul on the MXU, f32 accumulation.
    h = jnp.dot(x, w1_ref[...], preferred_element_type=jnp.float32)
    # Bias + ReLU on the f32 accumulator (VPU; v5e has no bf16 VALU).
    h = jnp.maximum(h + b1_ref[...], 0.0)
    # Cast hidden to the weight compute dtype before the second MXU matmul
    # (halves vreg/spill traffic at large tm); accumulate + bias in f32.
    y = jnp.dot(h.astype(w2_ref.dtype), w2_ref[...],
                preferred_element_type=jnp.float32)
    o_ref[...] = (y + b2_ref[...]).astype(o_ref.dtype)


def _num_tensorcores() -> int:
    """Best-effort TC count per device (v7x has 2); falls back to 1."""
    try:
        kind = jax.devices()[0].device_kind.lower()
        if "v7" in kind:
            return 2
    except Exception:
        pass
    return 1


def _pick_row_tile(B, n_cores=1):
    """Batch row tile: whole batch for small B, MXU-filling tiles otherwise."""
    if B <= 64:
        return B                       # single grid step, no pipeline overhead
    if B <= 128:
        if n_cores >= 2:
            # Split across the two v7x TensorCores (round up to sublane multiple).
            half = -(-B // 2)
            return -(-half // 8) * 8
        return B
    if B < 256:
        return 128
    if B < 2048:
        return 256                     # fills the 256-wide MXU M on v6e/v7x
    return 512


def prepare_projector_params(w1, b1, w2, b2, compute_dtype=jnp.bfloat16):
    """One-time parameter prep (hoisted out of the per-call hot path).

    Weights are cast to the MXU compute dtype (bf16 by default); biases stay
    f32 [1, out] rows for lane-aligned broadcast on the f32 accumulator.
    Use compute_dtype=jnp.float32 for a bit-faithful f32 debug path.
    """
    hidden = w1.shape[1]
    z_dim = w2.shape[1]
    return (w1.astype(compute_dtype),
            b1.reshape(1, hidden).astype(jnp.float32),
            w2.astype(compute_dtype),
            b2.reshape(1, z_dim).astype(jnp.float32))


def projector_forward(x, w1, b1, w2, b2, *, tm=None, out_dtype=None):
    """x: [B, feat_dim] -> [B, z_dim].

    w1/w2 should already be in the desired compute dtype (see
    `prepare_projector_params`); x is cast inside the kernel, so no extra
    HBM pass is paid for mixed-precision inputs. Pass out_dtype=jnp.bfloat16
    to halve output writeback bytes if the consumer accepts bf16.
    """
    B, feat_dim = x.shape
    assert w1.shape[0] == feat_dim
    hidden = w1.shape[1]
    z_dim = w2.shape[1]
    out_dtype = x.dtype if out_dtype is None else out_dtype

    # Biases: no-op if already prepared (f32 [1, out]); metadata-only otherwise.
    b1 = b1.reshape(1, hidden).astype(jnp.float32)
    b2 = b2.reshape(1, z_dim).astype(jnp.float32)

    if tm is None:
        tm = _pick_row_tile(B, _num_tensorcores())
    tm = min(tm, B)
    grid_m = pl.cdiv(B, tm)   # ragged B: last block is partially masked

    cost = pl.CostEstimate(
        flops=2 * B * (feat_dim * hidden + hidden * z_dim),
        transcendentals=0,
        bytes_accessed=(B * feat_dim * x.dtype.itemsize           # x
                        + feat_dim * hidden * w1.dtype.itemsize   # W1
                        + hidden * z_dim * w2.dtype.itemsize      # W2
                        + (hidden + z_dim) * 4                    # biases (f32)
                        + B * z_dim * jnp.dtype(out_dtype).itemsize),  # y
    )

    return pl.pallas_call(
        _mlp_kernel,
        out_shape=jax.ShapeDtypeStruct((B, z_dim), out_dtype),
        grid_spec=pltpu.PrefetchScalarGridSpec(
            num_scalar_prefetch=0,
            grid=(grid_m,),
            in_specs=[
                pl.BlockSpec((tm, feat_dim), lambda i: (i, 0)),      # x tile
                pl.BlockSpec((feat_dim, hidden), lambda i: (0, 0)),  # W1 (resident)
                pl.BlockSpec((1, hidden), lambda i: (0, 0)),         # b1
                pl.BlockSpec((hidden, z_dim), lambda i: (0, 0)),     # W2 (resident)
                pl.BlockSpec((1, z_dim), lambda i: (0, 0)),          # b2
            ],
            out_specs=pl.BlockSpec((tm, z_dim), lambda i: (i, 0)),
        ),
        # "parallel" lets the scheduler shard the row grid across cores where
        # supported (v7x megacore); rows are fully independent.
        compiler_params=pltpu.CompilerParams(
            dimension_semantics=("parallel",),
        ),
        cost_estimate=cost,
    )(x, w1, b1, w2, b2)


if __name__ == "__main__":
    # Module defaults: feat_dim=512, hidden=512, z_dim=128. Small batch.
    B, FEAT, HID, Z = 8, 512, 512, 128

    key = jax.random.PRNGKey(0)
    kx, kw1, kb1, kw2, kb2, kx2 = jax.random.split(key, 6)

    x = jax.random.normal(kx, (B, FEAT), dtype=jnp.float32)
    # PyTorch-Linear-like init: U(-1/sqrt(fan_in), 1/sqrt(fan_in))
    lim1 = 1.0 / (FEAT ** 0.5)
    lim2 = 1.0 / (HID ** 0.5)
    w1 = jax.random.uniform(kw1, (FEAT, HID), jnp.float32, -lim1, lim1)
    b1 = jax.random.uniform(kb1, (HID,), jnp.float32, -lim1, lim1)
    w2 = jax.random.uniform(kw2, (HID, Z), jnp.float32, -lim2, lim2)
    b2 = jax.random.uniform(kb2, (Z,), jnp.float32, -lim2, lim2)

    def ref_f32_fn(xi):
        return jnp.maximum(xi @ w1 + b1, 0.0) @ w2 + b2

    def ref_bf16_fn(xi):
        # Matched reference: same casts / accumulation as the bf16 kernel path.
        h = jnp.maximum(
            jnp.dot(xi.astype(jnp.bfloat16), w1.astype(jnp.bfloat16),
                    preferred_element_type=jnp.float32) + b1, 0.0)
        return jnp.dot(h.astype(jnp.bfloat16), w2.astype(jnp.bfloat16),
                       preferred_element_type=jnp.float32) + b2

    # One-time weight prep (casts hoisted out of the per-call hot path).
    w1c, b1c, w2c, b2c = prepare_projector_params(w1, b1, w2, b2)

    # Default fast path: bf16 operands, f32 accumulation, f32 output.
    y_bf16 = jax.block_until_ready(projector_forward(x, w1c, b1c, w2c, b2c))
    assert y_bf16.shape == (B, Z)
    assert jnp.allclose(y_bf16, ref_bf16_fn(x), atol=1e-2, rtol=1e-2)
    assert jnp.allclose(y_bf16, ref_f32_fn(x), atol=5e-2, rtol=5e-2)

    # Ragged batch (B=130, tm=128): exercises the masked last partial block
    # (replaces the old jnp.pad / out[:B] round-trip).
    B2 = 130
    x2 = jax.random.normal(kx2, (B2, FEAT), dtype=jnp.float32)
    y2 = jax.block_until_ready(projector_forward(x2, w1c, b1c, w2c, b2c))
    assert y2.shape == (B2, Z)
    assert jnp.allclose(y2, ref_bf16_fn(x2), atol=1e-2, rtol=1e-2)

    # Full-precision debug path: must match the f32 reference tightly.
    p32 = prepare_projector_params(w1, b1, w2, b2, compute_dtype=jnp.float32)
    y_f32 = jax.block_until_ready(projector_forward(x, *p32))
    assert y_f32.shape == (B, Z)
    assert jnp.allclose(y_f32, ref_f32_fn(x), atol=1e-4, rtol=1e-4)

    print("KERNEL_OK")
</pallas_src>

<mosaic_0001>
module attributes {stable_mosaic.version = 11 : i64} {
  func.func @_mlp_kernel(%arg0: i32, %arg1: memref<8x512xf32, #tpu.memory_space<vmem>>, %arg2: memref<512x512xbf16, #tpu.memory_space<vmem>>, %arg3: memref<1x512xf32, #tpu.memory_space<vmem>>, %arg4: memref<512x128xbf16, #tpu.memory_space<vmem>>, %arg5: memref<1x128xf32, #tpu.memory_space<vmem>>, %arg6: memref<8x128xf32, #tpu.memory_space<vmem>>) attributes {dimension_semantics = [#tpu.dimension_semantics<parallel>], iteration_bounds = array<i64: 1>, scalar_prefetch = 0 : i64, scratch_operands = 0 : i64, tpu.core_type = #tpu.core_type<tc>, window_params = [{transform_indices = @transform_0, window_bounds = array<i64: 8, 512>}, {pipeline_mode = #tpu.pipeline_mode<synchronous>, transform_indices = @transform_1, window_bounds = array<i64: 512, 512>}, {pipeline_mode = #tpu.pipeline_mode<synchronous>, transform_indices = @transform_2, window_bounds = array<i64: 1, 512>}, {pipeline_mode = #tpu.pipeline_mode<synchronous>, transform_indices = @transform_3, window_bounds = array<i64: 512, 128>}, {pipeline_mode = #tpu.pipeline_mode<synchronous>, transform_indices = @transform_4, window_bounds = array<i64: 1, 128>}, {transform_indices = @transform_5, window_bounds = array<i64: 8, 128>}]} {
    %c0 = arith.constant 0 : index
    %c0_0 = arith.constant 0 : index
    %0 = vector.load %arg1[%c0, %c0_0] : memref<8x512xf32, #tpu.memory_space<vmem>>, vector<8x512xf32>
    %1 = arith.truncf %0 : vector<8x512xf32> to vector<8x512xbf16>
    %c0_1 = arith.constant 0 : index
    %c0_2 = arith.constant 0 : index
    %2 = vector.load %arg2[%c0_1, %c0_2] : memref<512x512xbf16, #tpu.memory_space<vmem>>, vector<512x512xbf16>
    %cst = arith.constant dense<0.000000e+00> : vector<8x512xf32>
    %3 = tpu.matmul %1, %2, %cst {dimension_numbers = #tpu.dot_dimension_numbers<[1], [0], [0], [1], [0, 0, 1, 1], [], []>} : vector<8x512xbf16>, vector<512x512xbf16>, vector<8x512xf32> -> vector<8x512xf32>
    %c0_3 = arith.constant 0 : index
    %c0_4 = arith.constant 0 : index
    %4 = vector.load %arg3[%c0_3, %c0_4] : memref<1x512xf32, #tpu.memory_space<vmem>>, vector<1x512xf32>
    %5 = vector.broadcast %4 : vector<1x512xf32> to vector<8x512xf32>
    %6 = arith.addf %3, %5 : vector<8x512xf32>
    %cst_5 = arith.constant 0.000000e+00 : f32
    %7 = vector.broadcast %cst_5 : f32 to vector<8x512xf32>
    %8 = arith.maximumf %6, %7 : vector<8x512xf32>
    %9 = arith.truncf %8 : vector<8x512xf32> to vector<8x512xbf16>
    %c0_6 = arith.constant 0 : index
    %c0_7 = arith.constant 0 : index
    %10 = vector.load %arg4[%c0_6, %c0_7] : memref<512x128xbf16, #tpu.memory_space<vmem>>, vector<512x128xbf16>
    %cst_8 = arith.constant dense<0.000000e+00> : vector<8x128xf32>
    %11 = tpu.matmul %9, %10, %cst_8 {dimension_numbers = #tpu.dot_dimension_numbers<[1], [0], [0], [1], [0, 0, 1, 1], [], []>} : vector<8x512xbf16>, vector<512x128xbf16>, vector<8x128xf32> -> vector<8x128xf32>
    %c0_9 = arith.constant 0 : index
    %c0_10 = arith.constant 0 : index
    %12 = vector.load %arg5[%c0_9, %c0_10] : memref<1x128xf32, #tpu.memory_space<vmem>>, vector<1x128xf32>
    %13 = vector.broadcast %12 : vector<1x128xf32> to vector<8x128xf32>
    %14 = arith.addf %11, %13 : vector<8x128xf32>
    %c0_11 = arith.constant 0 : index
    %c0_12 = arith.constant 0 : index
    %15 = vector.load %arg6[%c0_11, %c0_12] : memref<8x128xf32, #tpu.memory_space<vmem>>, vector<8x128xf32>
    tpu.vector_store %arg6[%c0_11, %c0_12], %14 {strides = array<i32>} : memref<8x128xf32, #tpu.memory_space<vmem>>, vector<8x128xf32>,
    return
  }
  func.func @transform_0(%arg0: i32) -> (i32, i32) {
    %c0_i32 = arith.constant 0 : i32
    %c0_i32_0 = arith.constant 0 : i32
    return %arg0, %c0_i32 : i32, i32
  }
  func.func @transform_1(%arg0: i32) -> (i32, i32) {
    %c0_i32 = arith.constant 0 : i32
    %c0_i32_0 = arith.constant 0 : i32
    %c0_i32_1 = arith.constant 0 : i32
    return %c0_i32, %c0_i32_0 : i32, i32
  }
  func.func @transform_2(%arg0: i32) -> (i32, i32) {
    %c0_i32 = arith.constant 0 : i32
    %c0_i32_0 = arith.constant 0 : i32
    %c0_i32_1 = arith.constant 0 : i32
    return %c0_i32, %c0_i32_0 : i32, i32
  }
  func.func @transform_3(%arg0: i32) -> (i32, i32) {
    %c0_i32 = arith.constant 0 : i32
    %c0_i32_0 = arith.constant 0 : i32
    %c0_i32_1 = arith.constant 0 : i32
    return %c0_i32, %c0_i32_0 : i32, i32
  }
  func.func @transform_4(%arg0: i32) -> (i32, i32) {
    %c0_i32 = arith.constant 0 : i32
    %c0_i32_0 = arith.constant 0 : i32
    %c0_i32_1 = arith.constant 0 : i32
    return %c0_i32, %c0_i32_0 : i32, i32
  }
  func.func @transform_5(%arg0: i32) -> (i32, i32) {
    %c0_i32 = arith.constant 0 : i32
    %c0_i32_0 = arith.constant 0 : i32
    return %arg0, %c0_i32 : i32, i32
  }
}

</mosaic_0001>

<bundles_post_ra>
// kernel: tpu_custom_call.1
= control target key start
LH: loop header
LB: loop body
LE: loop exit
PB: predicated region body
PF: predicated region fallthrough
CT: control target
= control target key end

     0   :  { %10 = vsyncpa [#allocation3], 0  ;;  %s2439_s0 = inlined_call_operand.hbm [shape: f32[8,512], index: 0, kind: input, shape index: {}]   ;;  %s2440_s1 = inlined_call_operand.hbm [shape: bf16[512,512], index: 1, kind: input, shape index: {}]   ;;  %s2441_s2 = inlined_call_operand.hbm [shape: f32[1,512], index: 2, kind: input, shape index: {}]   ;;  %s2442_s3 = inlined_call_operand.hbm [shape: bf16[512,128], index: 3, kind: input, shape index: {}]   ;;  %s2443_s4 = inlined_call_operand.vmem [shape: f32[1,128], index: 4, kind: input, shape index: {}]   ;;  %s2444_s5 = inlined_call_operand.hbm [shape: f32[8,128], index: 5, kind: output, shape index: {}]  }
   0x1   :  { %11 = vsyncpa [#allocation6], 0 }
   0x2   :  { %12 = vsyncpa [#allocation9], 0  ;;  %s29_s20 = sshll.u32 %s2440_s1, 4  ;;  %s30_s20 = int_to_ptr.hbm [resolvable:$true] %s29_s20 }
   0x3   :  { %13 = vsyncpa [#allocation4], 0  ;;  %s2352_s21 = smov [#allocation5]   ;;  %s19_s25 = sshll.u32 %s2439_s0, 4  ;;  %s20_s25 = int_to_ptr.hbm [resolvable:$true] %s19_s25 }
   0x4   :  { %s31_s22 = sshll.u32 %s2352_s21, 4  ;;  %s2353_s26 = smov 256   ;;  %s32_s22 = int_to_ptr.vmem [resolvable:$true] %s31_s22 }
   0x5   :  { %s2354_s27 = smov 16   ;;  %s2355_s28 = smov [#allocation2]  }
   0x6   :  { %37 = dma.hbm_to_vmem [thread:$0]  %s30_s20, 16384, %s32_s22, [#allocation6], %s2353_s26, %s2353_s26, %s2354_s27  }
   0x7   :  { %s21_s29 = sshll.u32 %s2355_s28, 4  ;;  %s43_s7 = sshll.u32 %s2441_s2, 4  ;;  %s22_s29 = int_to_ptr.vmem [resolvable:$true] %s21_s29  ;;  %s44_s7 = int_to_ptr.hbm [resolvable:$true] %s43_s7 }
   0x8   :  { %24 = dma.hbm_to_vmem [thread:$0]  %s20_s25, 512, %s22_s29, [#allocation3]  }
   0x9   :  { %s53_s9 = sshll.u32 %s2442_s3, 4  ;;  %s2356_s10 = smov [#allocation7]   ;;  %s54_s9 = int_to_ptr.hbm [resolvable:$true] %s53_s9 }
   0xa   :  { %s45_s11 = sshll.u32 %s2356_s10, 4  ;;  %s2357_s0 = smov [#allocation8]   ;;  %s46_s11 = int_to_ptr.vmem [resolvable:$true] %s45_s11 }
   0xb   :  { %48 = dma.hbm_to_vmem [thread:$0]  %s44_s7, 64, %s46_s11, [#allocation6]  }
   0xc   :  { %s55_s12 = sshll.u32 %s2357_s0, 4  ;;  %s2358_s13 = smov 64   ;;  %s56_s12 = int_to_ptr.vmem [resolvable:$true] %s55_s12 }
   0xd   :  { %s2359_s14 = smov 4  }
   0xe   :  { %61 = dma.hbm_to_vmem [thread:$0]  %s54_s9, 4096, %s56_s12, [#allocation9], %s2358_s13, %s2358_s13, %s2359_s14  }
   0xf   :  { %2344 = dma.done.wait [#allocation3], 512  }
  0x10   :  { %2345 = vsyncadd [#allocation3], 4294966784 }
  0x11   :  { %2346 = dma.done.wait [#allocation6], 16448  }
  0x12   :  { %2347 = vsyncadd [#allocation6], 4294950848 }
  0x13   :  { %2348 = dma.done.wait [#allocation9], 4096  }
  0x14   :  { %2349 = vsyncadd [#allocation9], 4294963200  ;;  %v1528_v0 = vld [vmem:[#allocation5 + $0xe0] sm:$0xf]  ;;  %v2084_v1 = vld [vmem:[#allocation5 + $0xec] sm:$0xf0] }
  0x15   :  { %v1656_v2 = vld [vmem:[#allocation5 + $0x1e0] sm:$0xf]  ;;  %v1529_v3 = vor.u32 %v2084_v1, %v1528_v0  ;;  %v2116_v4 = vld [vmem:[#allocation5 + $0x1ec] sm:$0xf0]  ;;  %s2360_s15 = smov [#allocation10]   ;;  %s1402_s19 = sshll.u32 %s2444_s5, 4  ;;  %s1403_s19 = int_to_ptr.hbm [resolvable:$true] %s1402_s19 }
  0x16   :  { %v1784_v5 = vld [vmem:[#allocation5 + $0x2e0] sm:$0xf]  ;;  %v2148_v6 = vld [vmem:[#allocation5 + $0x2ec] sm:$0xf0]  ;;  %v1657_v7 = vor.u32 %v2116_v4, %v1656_v2  ;;  %s1400_s16 = sshll.u32 %s2360_s15, 4  ;;  %s1401_s16 = int_to_ptr.vmem [resolvable:$true] %s1400_s16 }
  0x17   :  { %v1785_v8 = vor.u32 %v2148_v6, %v1784_v5  ;;  %v1912_v9 = vld [vmem:[#allocation5 + $0x3e0] sm:$0xf]  ;;  %v2180_v10 = vld [vmem:[#allocation5 + $0x3ec] sm:$0xf0]  ;;  %866 = vmatpush.bf16.msra.mxu0 %v1529_v3 }
  0x18   :  { %v1512_v11 = vld [vmem:[#allocation5 + $0xc0] sm:$0xf]  ;;  %v1913_v12 = vor.u32 %v2180_v10, %v1912_v9  ;;  %v2080_v13 = vld [vmem:[#allocation5 + $0xcc] sm:$0xf0]  ;;  %879 = vmatpush.bf16.msra.mxu1 %v1657_v7 }
  0x19   :  { %v1640_v14 = vld [vmem:[#allocation5 + $0x1c0] sm:$0xf]  ;;  %v2112_v15 = vld [vmem:[#allocation5 + $0x1cc] sm:$0xf0]  ;;  %892 = vmatpush.bf16.msra.mxu2 %v1785_v8  ;;  %v1513_v16 = vor.u32 %v2080_v13, %v1512_v11 }
  0x1a   :  { %v1641_v17 = vor.u32 %v2112_v15, %v1640_v14  ;;  %v1768_v18 = vld [vmem:[#allocation5 + $0x2c0] sm:$0xf]  ;;  %v2144_v19 = vld [vmem:[#allocation5 + $0x2cc] sm:$0xf0]  ;;  %905 = vmatpush.bf16.msra.mxu3 %v1913_v12 }
  0x1b   :  { %v1896_v20 = vld [vmem:[#allocation5 + $0x3c0] sm:$0xf]  ;;  %v1769_v21 = vor.u32 %v2144_v19, %v1768_v18  ;;  %v2176_v22 = vld [vmem:[#allocation5 + $0x3cc] sm:$0xf0]  ;;  %867 = vmatpush.bf16.msra.mxu0 %v1513_v16 }
  0x1c   :  { %v1496_v23 = vld [vmem:[#allocation5 + $0xa0] sm:$0xf]  ;;  %v2076_v24 = vld [vmem:[#allocation5 + $0xac] sm:$0xf0]  ;;  %v1897_v25 = vor.u32 %v2176_v22, %v1896_v20  ;;  %880 = vmatpush.bf16.msra.mxu1 %v1641_v17 }
  0x1d   :  { %v1624_v26 = vld [vmem:[#allocation5 + $0x1a0] sm:$0xf]  ;;  %v2108_v27 = vld [vmem:[#allocation5 + $0x1ac] sm:$0xf0]  ;;  %v1497_v29 = vor.u32 %v2076_v24, %v1496_v23  ;;  %893 = vmatpush.bf16.msra.mxu2 %v1769_v21 }
  0x1e   :  { %v1752_v28 = vld [vmem:[#allocation5 + $0x2a0] sm:$0xf]  ;;  %v2140_v30 = vld [vmem:[#allocation5 + $0x2ac] sm:$0xf0]  ;;  %v1625_v33 = vor.u32 %v2108_v27, %v1624_v26  ;;  %906 = vmatpush.bf16.msra.mxu3 %v1897_v25 }
  0x1f   :  { %v1880_v31 = vld [vmem:[#allocation5 + $0x3a0] sm:$0xf]  ;;  %v2172_v32 = vld [vmem:[#allocation5 + $0x3ac] sm:$0xf0]  ;;  %v1753_v34 = vor.u32 %v2140_v30, %v1752_v28  ;;  %868 = vmatpush.bf16.msra.mxu0 %v1497_v29  ;;  %v2082_v28 = vld [vmem:[#allocation5 + $0xe4] sm:$0xf] }
  0x20   :  { %v1480_v35 = vld [vmem:[#allocation5 + $0x80] sm:$0xf]  ;;  %v2072_v36 = vld [vmem:[#allocation5 + $0x8c] sm:$0xf0]  ;;  %v1881_v38 = vor.u32 %v2172_v32, %v1880_v31  ;;  %881 = vmatpush.bf16.msra.mxu1 %v1625_v33  ;;  %v1530_v29 = vld [vmem:[#allocation5 + $0xf0] sm:$0xf0] }
  0x21   :  { %v1608_v37 = vld [vmem:[#allocation5 + $0x180] sm:$0xf]  ;;  %v2104_v39 = vld [vmem:[#allocation5 + $0x18c] sm:$0xf0]  ;;  %v1481_v44 = vor.u32 %v2072_v36, %v1480_v35  ;;  %894 = vmatpush.bf16.msra.mxu2 %v1753_v34  ;;  %v2114_v30 = vld [vmem:[#allocation5 + $0x1e4] sm:$0xf] }
  0x22   :  { %v1736_v40 = vld [vmem:[#allocation5 + $0x280] sm:$0xf]  ;;  %v2136_v41 = vld [vmem:[#allocation5 + $0x28c] sm:$0xf0]  ;;  %v1609_v45 = vor.u32 %v2104_v39, %v1608_v37  ;;  %907 = vmatpush.bf16.msra.mxu3 %v1881_v38  ;;  %v1658_v32 = vld [vmem:[#allocation5 + $0x1f0] sm:$0xf0] }
  0x23   :  { %v1864_v42 = vld [vmem:[#allocation5 + $0x380] sm:$0xf]  ;;  %v2168_v43 = vld [vmem:[#allocation5 + $0x38c] sm:$0xf0]  ;;  %v1737_v46 = vor.u32 %v2136_v41, %v1736_v40  ;;  %869 = vmatpush.bf16.msra.mxu0 %v1481_v44  ;;  %v2146_v33 = vld [vmem:[#allocation5 + $0x2e4] sm:$0xf]  ;;  %v1533_v40 = vor.u32 %v2082_v28, %v1530_v29  ;;  %v1661_v41 = vor.u32 %v2114_v30, %v1658_v32 }
  0x24   :  { %v1464_v47 = vld [vmem:[#allocation5 + $0x60] sm:$0xf]  ;;  %v2068_v48 = vld [vmem:[#allocation5 + $0x6c] sm:$0xf0]  ;;  %v1865_v50 = vor.u32 %v2168_v43, %v1864_v42  ;;  %882 = vmatpush.bf16.msra.mxu1 %v1609_v45  ;;  %v1786_v34 = vld [vmem:[#allocation5 + $0x2f0] sm:$0xf0] }
  0x25   :  { %v1592_v49 = vld [vmem:[#allocation5 + $0x160] sm:$0xf]  ;;  %v2100_v51 = vld [vmem:[#allocation5 + $0x16c] sm:$0xf0]  ;;  %v1465_v56 = vor.u32 %v2068_v48, %v1464_v47  ;;  %895 = vmatpush.bf16.msra.mxu2 %v1737_v46  ;;  %v2178_v37 = vld [vmem:[#allocation5 + $0x3e4] sm:$0xf]  ;;  %v1789_v42 = vor.u32 %v2146_v33, %v1786_v34 }
  0x26   :  { %v1720_v52 = vld [vmem:[#allocation5 + $0x260] sm:$0xf]  ;;  %v2132_v53 = vld [vmem:[#allocation5 + $0x26c] sm:$0xf0]  ;;  %v1593_v57 = vor.u32 %v2100_v51, %v1592_v49  ;;  %908 = vmatpush.bf16.msra.mxu3 %v1865_v50  ;;  %v1914_v38 = vld [vmem:[#allocation5 + $0x3f0] sm:$0xf0] }
  0x27   :  { %v1848_v54 = vld [vmem:[#allocation5 + $0x360] sm:$0xf]  ;;  %v2164_v55 = vld [vmem:[#allocation5 + $0x36c] sm:$0xf0]  ;;  %v1721_v58 = vor.u32 %v2132_v53, %v1720_v52  ;;  %870 = vmatpush.bf16.msra.mxu0 %v1465_v56  ;;  %v2078_v43 = vld [vmem:[#allocation5 + $0xc4] sm:$0xf]  ;;  %v1917_v46 = vor.u32 %v2178_v37, %v1914_v38 }
  0x28   :  { %v1448_v59 = vld [vmem:[#allocation5 + $0x40] sm:$0xf]  ;;  %v2064_v60 = vld [vmem:[#allocation5 + $0x4c] sm:$0xf0]  ;;  %v1849_v62 = vor.u32 %v2164_v55, %v1848_v54  ;;  %883 = vmatpush.bf16.msra.mxu1 %v1593_v57  ;;  %v1514_v44 = vld [vmem:[#allocation5 + $0xd0] sm:$0xf0] }
  0x29   :  { %v1576_v61 = vld [vmem:[#allocation5 + $0x140] sm:$0xf]  ;;  %v2096_v63 = vld [vmem:[#allocation5 + $0x14c] sm:$0xf0]  ;;  %v1449_v4 = vor.u32 %v2064_v60, %v1448_v59  ;;  %896 = vmatpush.bf16.msra.mxu2 %v1721_v58  ;;  %v2110_v45 = vld [vmem:[#allocation5 + $0x1c4] sm:$0xf]  ;;  %v1517_v53 = vor.u32 %v2078_v43, %v1514_v44 }
  0x2a   :  { %v1704_v0 = vld [vmem:[#allocation5 + $0x240] sm:$0xf]  ;;  %v2128_v1 = vld [vmem:[#allocation5 + $0x24c] sm:$0xf0]  ;;  %v1577_v5 = vor.u32 %v2096_v63, %v1576_v61  ;;  %909 = vmatpush.bf16.msra.mxu3 %v1849_v62  ;;  %v1642_v47 = vld [vmem:[#allocation5 + $0x1d0] sm:$0xf0] }
  0x2b   :  { %v1832_v2 = vld [vmem:[#allocation5 + $0x340] sm:$0xf]  ;;  %v2160_v3 = vld [vmem:[#allocation5 + $0x34c] sm:$0xf0]  ;;  %v1705_v6 = vor.u32 %v2128_v1, %v1704_v0  ;;  %871 = vmatpush.bf16.msra.mxu0 %v1449_v4  ;;  %v2142_v48 = vld [vmem:[#allocation5 + $0x2c4] sm:$0xf]  ;;  %v1645_v58 = vor.u32 %v2110_v45, %v1642_v47 }
  0x2c   :  { %v1432_v7 = vld [vmem:[#allocation5 + $0x20] sm:$0xf]  ;;  %v2060_v8 = vld [vmem:[#allocation5 + $0x2c] sm:$0xf0]  ;;  %v1833_v10 = vor.u32 %v2160_v3, %v1832_v2  ;;  %884 = vmatpush.bf16.msra.mxu1 %v1577_v5  ;;  %v1770_v49 = vld [vmem:[#allocation5 + $0x2d0] sm:$0xf0] }
  0x2d   :  { %v1560_v9 = vld [vmem:[#allocation5 + $0x120] sm:$0xf]  ;;  %v2092_v11 = vld [vmem:[#allocation5 + $0x12c] sm:$0xf0]  ;;  %v1433_v16 = vor.u32 %v2060_v8, %v1432_v7  ;;  %897 = vmatpush.bf16.msra.mxu2 %v1705_v6  ;;  %v2174_v50 = vld [vmem:[#allocation5 + $0x3c4] sm:$0xf]  ;;  %v1773_v59 = vor.u32 %v2142_v48, %v1770_v49 }
  0x2e   :  { %v1688_v12 = vld [vmem:[#allocation5 + $0x220] sm:$0xf]  ;;  %v2124_v13 = vld [vmem:[#allocation5 + $0x22c] sm:$0xf0]  ;;  %v1561_v19 = vor.u32 %v2092_v11, %v1560_v9  ;;  %910 = vmatpush.bf16.msra.mxu3 %v1833_v10  ;;  %v1898_v51 = vld [vmem:[#allocation5 + $0x3d0] sm:$0xf0] }
  0x2f   :  { %v1816_v14 = vld [vmem:[#allocation5 + $0x320] sm:$0xf]  ;;  %v2156_v15 = vld [vmem:[#allocation5 + $0x32c] sm:$0xf0]  ;;  %v1689_v20 = vor.u32 %v2124_v13, %v1688_v12  ;;  %872 = vmatpush.bf16.msra.mxu0 %v1433_v16  ;;  %v2074_v54 = vld [vmem:[#allocation5 + $0xa4] sm:$0xf]  ;;  %v1901_v63 = vor.u32 %v2174_v50, %v1898_v51 }
  0x30   :  { %v1416_v17 = vld [vmem:[#allocation5] sm:$0xf]  ;;  %v2056_v18 = vld [vmem:[#allocation5 + $0xc] sm:$0xf0]  ;;  %v1817_v24 = vor.u32 %v2156_v15, %v1816_v14  ;;  %885 = vmatpush.bf16.msra.mxu1 %v1561_v19  ;;  %v1498_v55 = vld [vmem:[#allocation5 + $0xb0] sm:$0xf0] }
  0x31   :  { %v1544_v21 = vld [vmem:[#allocation5 + $0x100] sm:$0xf]  ;;  %v2088_v22 = vld [vmem:[#allocation5 + $0x10c] sm:$0xf0]  ;;  %v1417_v31 = vor.u32 %v2056_v18, %v1416_v17  ;;  %898 = vmatpush.bf16.msra.mxu2 %v1689_v20  ;;  %v2106_v56 = vld [vmem:[#allocation5 + $0x1a4] sm:$0xf]  ;;  %v1501_v8 = vor.u32 %v2074_v54, %v1498_v55 }
  0x32   :  { %v1672_v23 = vld [vmem:[#allocation5 + $0x200] sm:$0xf]  ;;  %v2120_v25 = vld [vmem:[#allocation5 + $0x20c] sm:$0xf0]  ;;  %v1545_v35 = vor.u32 %v2088_v22, %v1544_v21  ;;  %911 = vmatpush.bf16.msra.mxu3 %v1817_v24  ;;  %v1626_v60 = vld [vmem:[#allocation5 + $0x1b0] sm:$0xf0] }
  0x33   :  { %v1800_v26 = vld [vmem:[#allocation5 + $0x300] sm:$0xf]  ;;  %v2152_v27 = vld [vmem:[#allocation5 + $0x30c] sm:$0xf0]  ;;  %v1673_v36 = vor.u32 %v2120_v25, %v1672_v23  ;;  %873 = vmatpush.bf16.msra.mxu0 %v1417_v31  ;;  %v2138_v61 = vld [vmem:[#allocation5 + $0x2a4] sm:$0xf]  ;;  %v1629_v9 = vor.u32 %v2106_v56, %v1626_v60 }
  0x34   :  { %v1801_v39 = vor.u32 %v2152_v27, %v1800_v26  ;;  %886 = vmatpush.bf16.msra.mxu1 %v1545_v35  ;;  %v82_v52 = vld [vmem:[#allocation2 + $0x10] sm:$0xff]  ;;  %v80_v0 = vld [vmem:[#allocation2] sm:$0xff]  ;;  %v83_v1 = vld [vmem:[#allocation2 + $0x18] sm:$0xff] }
  0x35   :  { %899 = vmatpush.bf16.msra.mxu2 %v1673_v36  ;;  %v2403_v57 = vpack.c.bf16 %v82_v52, %v82_v52  ;;  %v1754_v62 = vld [vmem:[#allocation5 + $0x2b0] sm:$0xf0]  ;;  %v81_v2 = vld [vmem:[#allocation2 + $0x8] sm:$0xff]  ;;  %v2170_v3 = vld [vmem:[#allocation5 + $0x3a4] sm:$0xf]  ;;  %v2406_v5 = vpack.c.bf16 %v80_v0, %v80_v0  ;;  %v2408_v6 = vpack.c.bf16 %v83_v1, %v83_v1 }
  0x36   :  { %912 = vmatpush.bf16.msra.mxu3 %v1801_v39  ;;  %v1882_v4 = vld [vmem:[#allocation5 + $0x3b0] sm:$0xf0]  ;;  %v2410_v7 = vpack.c.bf16 %v81_v2, %v81_v2  ;;  %v1757_v10 = vor.u32 %v2138_v61, %v1754_v62  ;;  %v2070_v11 = vld [vmem:[#allocation5 + $0x84] sm:$0xf] }
  0x37   :  { %918 = vmatpush.bf16.msrb.mxu0 %v1533_v40  ;;  %v1482_v12 = vld [vmem:[#allocation5 + $0x90] sm:$0xf0]  ;;  %v2102_v13 = vld [vmem:[#allocation5 + $0x184] sm:$0xf]  ;;  %v1885_v14 = vor.u32 %v2170_v3, %v1882_v4 }
  0x38   :  { %931 = vmatpush.bf16.msrb.mxu1 %v1661_v41  ;;  %900 = vmatmul.bf16.vlgmr.msra.gmra.mxu2 %v2403_v57  ;;  %v1610_v15 = vld [vmem:[#allocation5 + $0x190] sm:$0xf0]  ;;  %v2134_v16 = vld [vmem:[#allocation5 + $0x284] sm:$0xf]  ;;  %v1485_v20 = vor.u32 %v2070_v11, %v1482_v12  ;;  %v2117_v12 = vld [vmem:[#allocation5 + $0x1f4] sm:$0xf0] }
  0x39   :  { %944 = vmatpush.bf16.msrb.mxu2 %v1789_v42  ;;  %v1738_v17 = vld [vmem:[#allocation5 + $0x290] sm:$0xf0]  ;;  %874 = vmatmul.bf16.vlgmr.msra.gmra.mxu0 %v2406_v5  ;;  %v2166_v18 = vld [vmem:[#allocation5 + $0x384] sm:$0xf]  ;;  %v1613_v21 = vor.u32 %v2102_v13, %v1610_v15  ;;  %v1792_v13 = vld [vmem:[#allocation5 + $0x2e8] sm:$0xf] }
  0x3a   :  { %957 = vmatpush.bf16.msrb.mxu3 %v1917_v46  ;;  %v1866_v19 = vld [vmem:[#allocation5 + $0x390] sm:$0xf0]  ;;  %887 = vmatmul.bf16.vlgmr.msra.gmra.mxu1 %v2410_v7  ;;  %v1741_v22 = vor.u32 %v2134_v16, %v1738_v17  ;;  %v2066_v23 = vld [vmem:[#allocation5 + $0x64] sm:$0xf]  ;;  %v1920_v17 = vld [vmem:[#allocation5 + $0x3e8] sm:$0xf] }
  0x3b   :  { %919 = vmatpush.bf16.msrb.mxu0 %v1517_v53  ;;  %913 = vmatmul.bf16.vlgmr.msra.gmra.mxu3 %v2408_v6  ;;  %v1466_v24 = vld [vmem:[#allocation5 + $0x70] sm:$0xf0]  ;;  %v2098_v25 = vld [vmem:[#allocation5 + $0x164] sm:$0xf]  ;;  %v1869_v26 = vor.u32 %v2166_v18, %v1866_v19  ;;  %v2181_v18 = vld [vmem:[#allocation5 + $0x3f4] sm:$0xf0] }
  0x3c   :  { %932 = vmatpush.bf16.msrb.mxu1 %v1645_v58  ;;  %v1594_v27 = vld [vmem:[#allocation5 + $0x170] sm:$0xf0]  ;;  %v2130_v28 = vld [vmem:[#allocation5 + $0x264] sm:$0xf]  ;;  %v1469_v32 = vor.u32 %v2066_v23, %v1466_v24  ;;  %v1520_v23 = vld [vmem:[#allocation5 + $0xc8] sm:$0xf] }
  0x3d   :  { %945 = vmatpush.bf16.msrb.mxu2 %v1773_v59  ;;  %v1722_v29 = vld [vmem:[#allocation5 + $0x270] sm:$0xf0]  ;;  %v2162_v30 = vld [vmem:[#allocation5 + $0x364] sm:$0xf]  ;;  %v1597_v33 = vor.u32 %v2098_v25, %v1594_v27  ;;  %v2081_v24 = vld [vmem:[#allocation5 + $0xd4] sm:$0xf0] }
  0x3e   :  { %958 = vmatpush.bf16.msrb.mxu3 %v1901_v63  ;;  %v1850_v31 = vld [vmem:[#allocation5 + $0x370] sm:$0xf0]  ;;  %v1725_v34 = vor.u32 %v2130_v28, %v1722_v29  ;;  %v2062_v35 = vld [vmem:[#allocation5 + $0x44] sm:$0xf]  ;;  %v1648_v25 = vld [vmem:[#allocation5 + $0x1c8] sm:$0xf] }
  0x3f   :  { %920 = vmatpush.bf16.msrb.mxu0 %v1501_v8  ;;  %v1450_v36 = vld [vmem:[#allocation5 + $0x50] sm:$0xf0]  ;;  %v2094_v37 = vld [vmem:[#allocation5 + $0x144] sm:$0xf]  ;;  %v1853_v38 = vor.u32 %v2162_v30, %v1850_v31  ;;  %v1536_v8 = vld [vmem:[#allocation5 + $0xe8] sm:$0xf] }
  0x40   :  { %933 = vmatpush.bf16.msrb.mxu1 %v1629_v9  ;;  %v1578_v39 = vld [vmem:[#allocation5 + $0x150] sm:$0xf0]  ;;  %v2126_v40 = vld [vmem:[#allocation5 + $0x244] sm:$0xf]  ;;  %v1453_v44 = vor.u32 %v2062_v35, %v1450_v36  ;;  %v2085_v9 = vld [vmem:[#allocation5 + $0xf4] sm:$0xf0] }
  0x41   :  { %946 = vmatpush.bf16.msrb.mxu2 %v1757_v10  ;;  %v1706_v41 = vld [vmem:[#allocation5 + $0x250] sm:$0xf0]  ;;  %v2158_v42 = vld [vmem:[#allocation5 + $0x344] sm:$0xf]  ;;  %v1581_v45 = vor.u32 %v2094_v37, %v1578_v39  ;;  %v1664_v10 = vld [vmem:[#allocation5 + $0x1e8] sm:$0xf] }
  0x42   :  { %959 = vmatpush.bf16.msrb.mxu3 %v1885_v14  ;;  %v1834_v43 = vld [vmem:[#allocation5 + $0x350] sm:$0xf0]  ;;  %v1709_v46 = vor.u32 %v2126_v40, %v1706_v41  ;;  %v2058_v47 = vld [vmem:[#allocation5 + $0x24] sm:$0xf]  ;;  %v2149_v14 = vld [vmem:[#allocation5 + $0x2f4] sm:$0xf0] }
  0x43   :  { %921 = vmatpush.bf16.msrb.mxu0 %v1485_v20  ;;  %v1434_v48 = vld [vmem:[#allocation5 + $0x30] sm:$0xf0]  ;;  %v2090_v49 = vld [vmem:[#allocation5 + $0x124] sm:$0xf]  ;;  %v1837_v50 = vor.u32 %v2158_v42, %v1834_v43  ;;  %v1537_v20 = vor.u32 %v2085_v9, %v1536_v8  ;;  %v2113_v27 = vld [vmem:[#allocation5 + $0x1d4] sm:$0xf0] }
  0x44   :  { %934 = vmatpush.bf16.msrb.mxu1 %v1613_v21  ;;  %v1562_v51 = vld [vmem:[#allocation5 + $0x130] sm:$0xf0]  ;;  %v2122_v52 = vld [vmem:[#allocation5 + $0x224] sm:$0xf]  ;;  %v1437_v56 = vor.u32 %v2058_v47, %v1434_v48  ;;  %v1665_v21 = vor.u32 %v2117_v12, %v1664_v10  ;;  %v1776_v28 = vld [vmem:[#allocation5 + $0x2c8] sm:$0xf] }
  0x45   :  { %947 = vmatpush.bf16.msrb.mxu2 %v1741_v22  ;;  %v1690_v53 = vld [vmem:[#allocation5 + $0x230] sm:$0xf0]  ;;  %v2154_v54 = vld [vmem:[#allocation5 + $0x324] sm:$0xf]  ;;  %v1565_v60 = vor.u32 %v2090_v49, %v1562_v51  ;;  %v1793_v22 = vor.u32 %v2149_v14, %v1792_v13  ;;  %v2145_v29 = vld [vmem:[#allocation5 + $0x2d4] sm:$0xf0] }
  0x46   :  { %960 = vmatpush.bf16.msrb.mxu3 %v1869_v26  ;;  %v1818_v55 = vld [vmem:[#allocation5 + $0x330] sm:$0xf0]  ;;  %v2054_v58 = vld [vmem:[#allocation5 + $0x4] sm:$0xf]  ;;  %v1693_v61 = vor.u32 %v2122_v52, %v1690_v53  ;;  %v1921_v26 = vor.u32 %v2181_v18, %v1920_v17  ;;  %v1904_v30 = vld [vmem:[#allocation5 + $0x3c8] sm:$0xf] }
  0x47   :  { %922 = vmatpush.bf16.msrb.mxu0 %v1469_v32  ;;  %v1418_v59 = vld [vmem:[#allocation5 + $0x10] sm:$0xf0]  ;;  %v2086_v62 = vld [vmem:[#allocation5 + $0x104] sm:$0xf]  ;;  %v1821_v1 = vor.u32 %v2154_v54, %v1818_v55  ;;  %v2177_v31 = vld [vmem:[#allocation5 + $0x3d4] sm:$0xf0]  ;;  %v1521_v32 = vor.u32 %v2081_v24, %v1520_v23 }
  0x48   :  { %935 = vmatpush.bf16.msrb.mxu1 %v1597_v33  ;;  %v1546_v63 = vld [vmem:[#allocation5 + $0x110] sm:$0xf0]  ;;  %v2118_v0 = vld [vmem:[#allocation5 + $0x204] sm:$0xf]  ;;  %v1421_v11 = vor.u32 %v2054_v58, %v1418_v59  ;;  %v1649_v33 = vor.u32 %v2113_v27, %v1648_v25  ;;  %v1504_v35 = vld [vmem:[#allocation5 + $0xa8] sm:$0xf] }
  0x49   :  { %948 = vmatpush.bf16.msrb.mxu2 %v1725_v34  ;;  %v1674_v2 = vld [vmem:[#allocation5 + $0x210] sm:$0xf0]  ;;  %v2150_v3 = vld [vmem:[#allocation5 + $0x304] sm:$0xf]  ;;  %v1549_v15 = vor.u32 %v2086_v62, %v1546_v63  ;;  %v1777_v34 = vor.u32 %v2145_v29, %v1776_v28  ;;  %v2077_v36 = vld [vmem:[#allocation5 + $0xb4] sm:$0xf0] }
  0x4a   :  { %961 = vmatpush.bf16.msrb.mxu3 %v1853_v38  ;;  %v1802_v4 = vld [vmem:[#allocation5 + $0x310] sm:$0xf0]  ;;  %v1677_v16 = vor.u32 %v2118_v0, %v1674_v2  ;;  %v1632_v37 = vld [vmem:[#allocation5 + $0x1a8] sm:$0xf]  ;;  %v1905_v38 = vor.u32 %v2177_v31, %v1904_v30  ;;  %v2109_v39 = vld [vmem:[#allocation5 + $0x1b4] sm:$0xf0] }
  0x4b   :  { %923 = vmatpush.bf16.msrb.mxu0 %v1453_v44  ;;  %v1805_v19 = vor.u32 %v2150_v3, %v1802_v4  ;;  %v1760_v40 = vld [vmem:[#allocation5 + $0x2a8] sm:$0xf]  ;;  %v2141_v41 = vld [vmem:[#allocation5 + $0x2b4] sm:$0xf0]  ;;  %v1505_v44 = vor.u32 %v2077_v36, %v1504_v35 }
  0x4c   :  { %936 = vmatpush.bf16.msrb.mxu1 %v1581_v45  ;;  %v1888_v42 = vld [vmem:[#allocation5 + $0x3a8] sm:$0xf]  ;;  %v2173_v43 = vld [vmem:[#allocation5 + $0x3b4] sm:$0xf0]  ;;  %v1633_v45 = vor.u32 %v2109_v39, %v1632_v37 }
  0x4d   :  { %949 = vmatpush.bf16.msrb.mxu2 %v1709_v46  ;;  %v1761_v46 = vor.u32 %v2141_v41, %v1760_v40  ;;  %v1488_v47 = vld [vmem:[#allocation5 + $0x88] sm:$0xf]  ;;  %v2073_v48 = vld [vmem:[#allocation5 + $0x94] sm:$0xf0] }
  0x4e   :  { %962 = vmatpush.bf16.msrb.mxu3 %v1837_v50  ;;  %v1616_v49 = vld [vmem:[#allocation5 + $0x188] sm:$0xf]  ;;  %v1889_v50 = vor.u32 %v2173_v43, %v1888_v42  ;;  %v2105_v51 = vld [vmem:[#allocation5 + $0x194] sm:$0xf0] }
  0x4f   :  { %924 = vmatpush.bf16.msrb.mxu0 %v1437_v56  ;;  %v1744_v52 = vld [vmem:[#allocation5 + $0x288] sm:$0xf]  ;;  %v2137_v53 = vld [vmem:[#allocation5 + $0x294] sm:$0xf0]  ;;  %v1489_v56 = vor.u32 %v2073_v48, %v1488_v47  ;;  %v1617_v58 = vor.u32 %v2105_v51, %v1616_v49  ;;  %v1666_v48 = vld [vmem:[#allocation5 + $0x1f8] sm:$0xf0] }
  0x50   :  { %937 = vmatpush.bf16.msrb.mxu1 %v1565_v60  ;;  %v1872_v54 = vld [vmem:[#allocation5 + $0x388] sm:$0xf]  ;;  %v2169_v55 = vld [vmem:[#allocation5 + $0x394] sm:$0xf0]  ;;  %v1745_v59 = vor.u32 %v2137_v53, %v1744_v52  ;;  %v2147_v49 = vld [vmem:[#allocation5 + $0x2ec] sm:$0xf] }
  0x51   :  { %950 = vmatpush.bf16.msrb.mxu2 %v1693_v61  ;;  %v1472_v60 = vld [vmem:[#allocation5 + $0x68] sm:$0xf]  ;;  %v2069_v61 = vld [vmem:[#allocation5 + $0x74] sm:$0xf0]  ;;  %v1873_v63 = vor.u32 %v2169_v55, %v1872_v54  ;;  %v2179_v53 = vld [vmem:[#allocation5 + $0x3ec] sm:$0xf] }
  0x52   :  { %963 = vmatpush.bf16.msrb.mxu3 %v1821_v1  ;;  %v1600_v62 = vld [vmem:[#allocation5 + $0x168] sm:$0xf]  ;;  %v2101_v0 = vld [vmem:[#allocation5 + $0x174] sm:$0xf0]  ;;  %v1473_v8 = vor.u32 %v2069_v61, %v1472_v60  ;;  %v1922_v54 = vld [vmem:[#allocation5 + $0x3f8] sm:$0xf0] }
  0x53   :  { %925 = vmatpush.bf16.msrb.mxu0 %v1421_v11  ;;  %v1728_v1 = vld [vmem:[#allocation5 + $0x268] sm:$0xf]  ;;  %v2133_v2 = vld [vmem:[#allocation5 + $0x274] sm:$0xf0]  ;;  %v1601_v9 = vor.u32 %v2101_v0, %v1600_v62  ;;  %v2079_v60 = vld [vmem:[#allocation5 + $0xcc] sm:$0xf] }
  0x54   :  { %938 = vmatpush.bf16.msrb.mxu1 %v1549_v15  ;;  %v1856_v3 = vld [vmem:[#allocation5 + $0x368] sm:$0xf]  ;;  %v2165_v4 = vld [vmem:[#allocation5 + $0x374] sm:$0xf0]  ;;  %v1729_v10 = vor.u32 %v2133_v2, %v1728_v1  ;;  %v1522_v61 = vld [vmem:[#allocation5 + $0xd8] sm:$0xf0] }
  0x55   :  { %951 = vmatpush.bf16.msrb.mxu2 %v1677_v16  ;;  %v1456_v11 = vld [vmem:[#allocation5 + $0x48] sm:$0xf]  ;;  %v2065_v12 = vld [vmem:[#allocation5 + $0x54] sm:$0xf0]  ;;  %v1857_v14 = vor.u32 %v2165_v4, %v1856_v3  ;;  %v2111_v62 = vld [vmem:[#allocation5 + $0x1cc] sm:$0xf] }
  0x56   :  { %964 = vmatpush.bf16.msrb.mxu3 %v1805_v19  ;;  %926 = vmatmul.bf16.vlgmr.msrb.gmra.mxu0 %v2406_v5  ;;  %v1584_v13 = vld [vmem:[#allocation5 + $0x148] sm:$0xf]  ;;  %v2097_v15 = vld [vmem:[#allocation5 + $0x154] sm:$0xf0]  ;;  %v1650_v0 = vld [vmem:[#allocation5 + $0x1d8] sm:$0xf0] }
  0x57   :  { %970 = vmatpush.bf16.msra.mxu0 %v1537_v20  ;;  %939 = vmatmul.bf16.vlgmr.msrb.gmra.mxu1 %v2410_v7  ;;  %v1712_v16 = vld [vmem:[#allocation5 + $0x248] sm:$0xf]  ;;  %v2129_v17 = vld [vmem:[#allocation5 + $0x254] sm:$0xf0]  ;;  %v1457_v20 = vor.u32 %v2065_v12, %v1456_v11  ;;  %v2143_v1 = vld [vmem:[#allocation5 + $0x2cc] sm:$0xf] }
  0x58   :  { %983 = vmatpush.bf16.msra.mxu1 %v1665_v21  ;;  %952 = vmatmul.bf16.vlgmr.msrb.gmra.mxu2 %v2403_v57  ;;  %v1840_v18 = vld [vmem:[#allocation5 + $0x348] sm:$0xf]  ;;  %v2161_v19 = vld [vmem:[#allocation5 + $0x354] sm:$0xf0]  ;;  %v1585_v21 = vor.u32 %v2097_v15, %v1584_v13  ;;  %v1778_v2 = vld [vmem:[#allocation5 + $0x2d8] sm:$0xf0] }
  0x59   :  { %996 = vmatpush.bf16.msra.mxu2 %v1793_v22  ;;  %965 = vmatmul.bf16.vlgmr.msrb.gmra.mxu3 %v2408_v6  ;;  %v1713_v22 = vor.u32 %v2129_v17, %v1712_v16  ;;  %v1440_v23 = vld [vmem:[#allocation5 + $0x28] sm:$0xf]  ;;  %v2061_v24 = vld [vmem:[#allocation5 + $0x34] sm:$0xf0]  ;;  %v2175_v3 = vld [vmem:[#allocation5 + $0x3cc] sm:$0xf] }
  0x5a   :  { %1009 = vmatpush.bf16.msra.mxu3 %v1921_v26  ;;  %v1568_v25 = vld [vmem:[#allocation5 + $0x128] sm:$0xf]  ;;  %v1841_v26 = vor.u32 %v2161_v19, %v1840_v18  ;;  %v2093_v27 = vld [vmem:[#allocation5 + $0x134] sm:$0xf0]  ;;  %v1906_v4 = vld [vmem:[#allocation5 + $0x3d8] sm:$0xf0] }
  0x5b   :  { %971 = vmatpush.bf16.msra.mxu0 %v1521_v32  ;;  %v1696_v28 = vld [vmem:[#allocation5 + $0x228] sm:$0xf]  ;;  %v2125_v29 = vld [vmem:[#allocation5 + $0x234] sm:$0xf0]  ;;  %v1441_v32 = vor.u32 %v2061_v24, %v1440_v23  ;;  %v1569_v35 = vor.u32 %v2093_v27, %v1568_v25  ;;  %v2075_v11 = vld [vmem:[#allocation5 + $0xac] sm:$0xf] }
  0x5c   :  { %984 = vmatpush.bf16.msra.mxu1 %v1649_v33  ;;  %v1824_v30 = vld [vmem:[#allocation5 + $0x328] sm:$0xf]  ;;  %v2157_v31 = vld [vmem:[#allocation5 + $0x334] sm:$0xf0]  ;;  %v1697_v36 = vor.u32 %v2125_v29, %v1696_v28  ;;  %v1506_v12 = vld [vmem:[#allocation5 + $0xb8] sm:$0xf0] }
  0x5d   :  { %997 = vmatpush.bf16.msra.mxu2 %v1777_v34  ;;  %v1424_v33 = vld [vmem:[#allocation5 + $0x8] sm:$0xf]  ;;  %v2057_v34 = vld [vmem:[#allocation5 + $0x14] sm:$0xf0]  ;;  %v1825_v40 = vor.u32 %v2157_v31, %v1824_v30  ;;  %v2107_v13 = vld [vmem:[#allocation5 + $0x1ac] sm:$0xf] }
  0x5e   :  { %1010 = vmatpush.bf16.msra.mxu3 %v1905_v38  ;;  %v1552_v37 = vld [vmem:[#allocation5 + $0x108] sm:$0xf]  ;;  %v2089_v38 = vld [vmem:[#allocation5 + $0x114] sm:$0xf0]  ;;  %v1425_v47 = vor.u32 %v2057_v34, %v1424_v33  ;;  %v1634_v15 = vld [vmem:[#allocation5 + $0x1b8] sm:$0xf0] }
  0x5f   :  { %972 = vmatpush.bf16.msra.mxu0 %v1505_v44  ;;  %v1680_v39 = vld [vmem:[#allocation5 + $0x208] sm:$0xf]  ;;  %v2121_v41 = vld [vmem:[#allocation5 + $0x214] sm:$0xf0]  ;;  %v2083_v44 = vld [vmem:[#allocation5 + $0xec] sm:$0xf]  ;;  %v1553_v51 = vor.u32 %v2089_v38, %v1552_v37 }
  0x60   :  { %985 = vmatpush.bf16.msra.mxu1 %v1633_v45  ;;  %v1808_v42 = vld [vmem:[#allocation5 + $0x308] sm:$0xf]  ;;  %v2153_v43 = vld [vmem:[#allocation5 + $0x314] sm:$0xf0]  ;;  %v1538_v45 = vld [vmem:[#allocation5 + $0xf8] sm:$0xf0]  ;;  %v1681_v52 = vor.u32 %v2121_v41, %v1680_v39 }
  0x61   :  { %998 = vmatpush.bf16.msra.mxu2 %v1761_v46  ;;  %v2115_v46 = vld [vmem:[#allocation5 + $0x1ec] sm:$0xf]  ;;  %v1809_v55 = vor.u32 %v2153_v43, %v1808_v42  ;;  %v1762_v17 = vld [vmem:[#allocation5 + $0x2b8] sm:$0xf0] }
  0x62   :  { %1011 = vmatpush.bf16.msra.mxu3 %v1889_v50  ;;  %v1794_v50 = vld [vmem:[#allocation5 + $0x2f8] sm:$0xf0]  ;;  %v2139_v16 = vld [vmem:[#allocation5 + $0x2ac] sm:$0xf] }
  0x63   :  { %973 = vmatpush.bf16.msra.mxu0 %v1489_v56  ;;  %v1541_v56 = vor.u32 %v2083_v44, %v1538_v45  ;;  %v2171_v18 = vld [vmem:[#allocation5 + $0x3ac] sm:$0xf]  ;;  %v1890_v19 = vld [vmem:[#allocation5 + $0x3b8] sm:$0xf0] }
  0x64   :  { %986 = vmatpush.bf16.msra.mxu1 %v1617_v58  ;;  %v1669_v58 = vor.u32 %v2115_v46, %v1666_v48  ;;  %v2071_v23 = vld [vmem:[#allocation5 + $0x8c] sm:$0xf]  ;;  %v1490_v24 = vld [vmem:[#allocation5 + $0x98] sm:$0xf0] }
  0x65   :  { %999 = vmatpush.bf16.msra.mxu2 %v1745_v59  ;;  %v1797_v59 = vor.u32 %v2147_v49, %v1794_v50  ;;  %v2103_v25 = vld [vmem:[#allocation5 + $0x18c] sm:$0xf]  ;;  %v1618_v27 = vld [vmem:[#allocation5 + $0x198] sm:$0xf0] }
  0x66   :  { %1012 = vmatpush.bf16.msra.mxu3 %v1873_v63  ;;  %v1925_v63 = vor.u32 %v2179_v53, %v1922_v54  ;;  %v2135_v28 = vld [vmem:[#allocation5 + $0x28c] sm:$0xf]  ;;  %v1746_v29 = vld [vmem:[#allocation5 + $0x298] sm:$0xf0]  ;;  %v1621_v33 = vor.u32 %v2103_v25, %v1618_v27 }
  0x67   :  { %974 = vmatpush.bf16.msra.mxu0 %v1473_v8  ;;  %v1525_v8 = vor.u32 %v2079_v60, %v1522_v61  ;;  %v2167_v30 = vld [vmem:[#allocation5 + $0x38c] sm:$0xf]  ;;  %v1874_v31 = vld [vmem:[#allocation5 + $0x398] sm:$0xf0]  ;;  %v1749_v34 = vor.u32 %v2135_v28, %v1746_v29  ;;  %v2186_v28 = vld [vmem:[#allocation8 + $0x20] sm:$0xff] }
  0x68   :  { %987 = vmatpush.bf16.msra.mxu1 %v1601_v9  ;;  %v1653_v9 = vor.u32 %v2111_v62, %v1650_v0  ;;  %v2099_v37 = vld [vmem:[#allocation5 + $0x16c] sm:$0xf]  ;;  %v1877_v38 = vor.u32 %v2167_v30, %v1874_v31  ;;  %v1602_v39 = vld [vmem:[#allocation5 + $0x178] sm:$0xf0]  ;;  %v2196_v29 = vld [vmem:[#allocation8 + $0x70] sm:$0xff] }
  0x69   :  { %1000 = vmatpush.bf16.msra.mxu2 %v1729_v10  ;;  %v1781_v10 = vor.u32 %v2143_v1, %v1778_v2  ;;  %v1730_v41 = vld [vmem:[#allocation5 + $0x278] sm:$0xf0]  ;;  %v2163_v42 = vld [vmem:[#allocation5 + $0x36c] sm:$0xf]  ;;  %v1605_v45 = vor.u32 %v2099_v37, %v1602_v39 }
  0x6a   :  { %1013 = vmatpush.bf16.msra.mxu3 %v1857_v14  ;;  %v1909_v14 = vor.u32 %v2175_v3, %v1906_v4  ;;  %v1858_v43 = vld [vmem:[#allocation5 + $0x378] sm:$0xf0]  ;;  %v2095_v49 = vld [vmem:[#allocation5 + $0x14c] sm:$0xf] }
  0x6b   :  { %975 = vmatpush.bf16.msra.mxu0 %v1457_v20  ;;  %v1509_v20 = vor.u32 %v2075_v11, %v1506_v12  ;;  %v1458_v48 = vld [vmem:[#allocation5 + $0x58] sm:$0xf0]  ;;  %v1861_v50 = vor.u32 %v2163_v42, %v1858_v43  ;;  %v2159_v54 = vld [vmem:[#allocation5 + $0x34c] sm:$0xf] }
  0x6c   :  { %988 = vmatpush.bf16.msra.mxu1 %v1585_v21  ;;  %v1637_v21 = vor.u32 %v2107_v13, %v1634_v15  ;;  %v1714_v53 = vld [vmem:[#allocation5 + $0x258] sm:$0xf0]  ;;  %v2059_v60 = vld [vmem:[#allocation5 + $0x2c] sm:$0xf] }
  0x6d   :  { %1001 = vmatpush.bf16.msra.mxu2 %v1713_v22  ;;  %v1765_v22 = vor.u32 %v2139_v16, %v1762_v17  ;;  %v1442_v61 = vld [vmem:[#allocation5 + $0x38] sm:$0xf0]  ;;  %v2091_v62 = vld [vmem:[#allocation5 + $0x12c] sm:$0xf] }
  0x6e   :  { %1014 = vmatpush.bf16.msra.mxu3 %v1841_v26  ;;  %v1893_v26 = vor.u32 %v2171_v18, %v1890_v19  ;;  %v1570_v0 = vld [vmem:[#allocation5 + $0x138] sm:$0xf0]  ;;  %v2123_v1 = vld [vmem:[#allocation5 + $0x22c] sm:$0xf] }
  0x6f   :  { %976 = vmatpush.bf16.msra.mxu0 %v1441_v32  ;;  %v1493_v32 = vor.u32 %v2071_v23, %v1490_v24  ;;  %v1698_v2 = vld [vmem:[#allocation5 + $0x238] sm:$0xf0]  ;;  %v2155_v3 = vld [vmem:[#allocation5 + $0x32c] sm:$0xf] }
  0x70   :  { %989 = vmatpush.bf16.msra.mxu1 %v1569_v35  ;;  %v2067_v35 = vld [vmem:[#allocation5 + $0x6c] sm:$0xf]  ;;  %v1826_v4 = vld [vmem:[#allocation5 + $0x338] sm:$0xf0] }
  0x71   :  { %1002 = vmatpush.bf16.msra.mxu2 %v1697_v36  ;;  %v1474_v36 = vld [vmem:[#allocation5 + $0x78] sm:$0xf0]  ;;  %v2055_v11 = vld [vmem:[#allocation5 + $0xc] sm:$0xf] }
  0x72   :  { %1015 = vmatpush.bf16.msra.mxu3 %v1825_v40  ;;  %v2131_v40 = vld [vmem:[#allocation5 + $0x26c] sm:$0xf]  ;;  %v1477_v44 = vor.u32 %v2067_v35, %v1474_v36  ;;  %v1426_v12 = vld [vmem:[#allocation5 + $0x18] sm:$0xf0]  ;;  %v2192_v35 = vld [vmem:[#allocation8 + $0x50] sm:$0xff] }
  0x73   :  { %977 = vmatpush.bf16.msra.mxu0 %v1425_v47  ;;  %v1733_v46 = vor.u32 %v2131_v40, %v1730_v41  ;;  %v2063_v47 = vld [vmem:[#allocation5 + $0x4c] sm:$0xf]  ;;  %v1554_v15 = vld [vmem:[#allocation5 + $0x118] sm:$0xf0] }
  0x74   :  { %990 = vmatpush.bf16.msra.mxu1 %v1553_v51  ;;  %v1586_v51 = vld [vmem:[#allocation5 + $0x158] sm:$0xf0]  ;;  %v2087_v13 = vld [vmem:[#allocation5 + $0x10c] sm:$0xf] }
  0x75   :  { %1003 = vmatpush.bf16.msra.mxu2 %v1681_v52  ;;  %v2127_v52 = vld [vmem:[#allocation5 + $0x24c] sm:$0xf]  ;;  %v1682_v17 = vld [vmem:[#allocation5 + $0x218] sm:$0xf0] }
  0x76   :  { %1016 = vmatpush.bf16.msra.mxu3 %v1809_v55  ;;  %978 = vmatmul.bf16.vlgmr.msra.gmra.mxu0 %v2406_v5  ;;  %v1842_v55 = vld [vmem:[#allocation5 + $0x358] sm:$0xf0]  ;;  %v2119_v16 = vld [vmem:[#allocation5 + $0x20c] sm:$0xf] }
  0x77   :  { %1022 = vmatpush.bf16.msrb.mxu0 %v1541_v56  ;;  %991 = vmatmul.bf16.vlgmr.msra.gmra.mxu1 %v2410_v7  ;;  %v1461_v56 = vor.u32 %v2063_v47, %v1458_v48  ;;  %v2151_v18 = vld [vmem:[#allocation5 + $0x30c] sm:$0xf]  ;;  %v1810_v19 = vld [vmem:[#allocation5 + $0x318] sm:$0xf0] }
  0x78   :  { %1035 = vmatpush.bf16.msrb.mxu1 %v1669_v58  ;;  %1004 = vmatmul.bf16.vlgmr.msra.gmra.mxu2 %v2403_v57  ;;  %v1589_v58 = vor.u32 %v2095_v49, %v1586_v51  ;;  %v1813_v23 = vor.u32 %v2151_v18, %v1810_v19  ;;  %v2189_v24 = vld [vmem:[#allocation8 + $0x38] sm:$0xff]  ;;  %v2187_v27 = vld [vmem:[#allocation8 + $0x28] sm:$0xff]  ;;  %v2204_v49 = vld [vmem:[#allocation8 + $0xb0] sm:$0xff] }
  0x79   :  { %1048 = vmatpush.bf16.msrb.mxu2 %v1797_v59  ;;  %1017 = vmatmul.bf16.vlgmr.msra.gmra.mxu3 %v2408_v6  ;;  %v1717_v59 = vor.u32 %v2127_v52, %v1714_v53  ;;  %v2197_v25 = vld [vmem:[#allocation8 + $0x78] sm:$0xff]  ;;  %v2195_v31 = vld [vmem:[#allocation8 + $0x68] sm:$0xff]  ;;  %v2210_v18 = vld [vmem:[#allocation8 + $0xe0] sm:$0xff] }
  0x7a   :  { %1061 = vmatpush.bf16.msrb.mxu3 %v1925_v63  ;;  %v1845_v63 = vor.u32 %v2159_v54, %v1842_v55  ;;  %v2185_v30 = vld [vmem:[#allocation8 + $0x18] sm:$0xff]  ;;  %v2191_v41 = vld [vmem:[#allocation8 + $0x48] sm:$0xff]  ;;  %v2202_v55 = vld [vmem:[#allocation8 + $0xa0] sm:$0xff] }
  0x7b   :  { %1023 = vmatpush.bf16.msrb.mxu0 %v1525_v8  ;;  %v1445_v8 = vor.u32 %v2059_v60, %v1442_v61  ;;  %v2203_v53 = vld [vmem:[#allocation8 + $0xa8] sm:$0xff]  ;;  %v2209_v19 = vld [vmem:[#allocation8 + $0xd8] sm:$0xff] }
  0x7c   :  { %1036 = vmatpush.bf16.msrb.mxu1 %v1653_v9  ;;  %v1573_v9 = vor.u32 %v2091_v62, %v1570_v0  ;;  %v2200_v62 = vld [vmem:[#allocation8 + $0x90] sm:$0xff] }
  0x7d   :  { %1049 = vmatpush.bf16.msrb.mxu2 %v1781_v10  ;;  %v1701_v10 = vor.u32 %v2123_v1, %v1698_v2  ;;  %v2199_v1 = vld [vmem:[#allocation8 + $0x88] sm:$0xff] }
  0x7e   :  { %1062 = vmatpush.bf16.msrb.mxu3 %v1909_v14  ;;  %v1829_v14 = vor.u32 %v2155_v3, %v1826_v4 }
  0x7f   :  { %1024 = vmatpush.bf16.msrb.mxu0 %v1509_v20  ;;  %v1429_v20 = vor.u32 %v2055_v11, %v1426_v12  ;;  %v2213_v12 = vld [vmem:[#allocation8 + $0xf8] sm:$0xff] }
  0x80   :  { %1037 = vmatpush.bf16.msrb.mxu1 %v1637_v21  ;;  %v1557_v21 = vor.u32 %v2087_v13, %v1554_v15 }
  0x81   :  { %1050 = vmatpush.bf16.msrb.mxu2 %v1765_v22  ;;  %v1685_v22 = vor.u32 %v2119_v16, %v1682_v17  ;;  %v2211_v17 = vld [vmem:[#allocation8 + $0xe8] sm:$0xff] }
  0x82   :  { %1063 = vmatpush.bf16.msrb.mxu3 %v1893_v26  ;;  %v2188_v26 = vld [vmem:[#allocation8 + $0x30] sm:$0xff] }
  0x83   :  { %1025 = vmatpush.bf16.msrb.mxu0 %v1493_v32  ;;  %v2184_v32 = vld [vmem:[#allocation8 + $0x10] sm:$0xff] }
  0x84   :  { %1038 = vmatpush.bf16.msrb.mxu1 %v1621_v33  ;;  %v2183_v33 = vld [vmem:[#allocation8 + $0x8] sm:$0xff] }
  0x85   :  { %1051 = vmatpush.bf16.msrb.mxu2 %v1749_v34 }
  0x86   :  { %1064 = vmatpush.bf16.msrb.mxu3 %v1877_v38 }
  0x87   :  { %1026 = vmatpush.bf16.msrb.mxu0 %v1477_v44  ;;  %v2190_v44 = vld [vmem:[#allocation8 + $0x40] sm:$0xff] }
  0x88   :  { %1039 = vmatpush.bf16.msrb.mxu1 %v1605_v45  ;;  %v2205_v45 = vld [vmem:[#allocation8 + $0xb8] sm:$0xff] }
  0x89   :  { %1052 = vmatpush.bf16.msrb.mxu2 %v1733_v46 }
  0x8a   :  { %1065 = vmatpush.bf16.msrb.mxu3 %v1861_v50 }
  0x8b   :  { %1027 = vmatpush.bf16.msrb.mxu0 %v1461_v56  ;;  %v2201_v56 = vld [vmem:[#allocation8 + $0x98] sm:$0xff] }
  0x8c   :  { %1040 = vmatpush.bf16.msrb.mxu1 %v1589_v58 }
  0x8d   :  { %1053 = vmatpush.bf16.msrb.mxu2 %v1717_v59 }
  0x8e   :  { %1066 = vmatpush.bf16.msrb.mxu3 %v1845_v63 }
  0x8f   :  { %1028 = vmatpush.bf16.msrb.mxu0 %v1445_v8 }
  0x90   :  { %1041 = vmatpush.bf16.msrb.mxu1 %v1573_v9 }
  0x91   :  { %1054 = vmatpush.bf16.msrb.mxu2 %v1701_v10  ;;  %v2198_v10 = vld [vmem:[#allocation8 + $0x80] sm:$0xff] }
  0x92   :  { %1067 = vmatpush.bf16.msrb.mxu3 %v1829_v14  ;;  %v2212_v14 = vld [vmem:[#allocation8 + $0xf0] sm:$0xff] }
  0x93   :  { %1029 = vmatpush.bf16.msrb.mxu0 %v1429_v20 }
  0x94   :  { %1042 = vmatpush.bf16.msrb.mxu1 %v1557_v21  ;;  %v2208_v21 = vld [vmem:[#allocation8 + $0xd0] sm:$0xff] }
  0x95   :  { %1055 = vmatpush.bf16.msrb.mxu2 %v1685_v22 }
  0x96   :  { %1068 = vmatpush.bf16.msrb.mxu3 %v1813_v23  ;;  %1030 = vmatmul.bf16.vlgmr.msrb.gmra.mxu0 %v2406_v5  ;;  %v2194_v5 = vld [vmem:[#allocation8 + $0x60] sm:$0xff] }
  0x97   :  { %1342 = vmatpush.bf16.msra.mxu0 %v2189_v24  ;;  %1043 = vmatmul.bf16.vlgmr.msrb.gmra.mxu1 %v2410_v7  ;;  %v2182_v7 = vld [vmem:[#allocation8] sm:$0xff] }
  0x98   :  { %1355 = vmatpush.bf16.msra.mxu1 %v2197_v25  ;;  %1056 = vmatmul.bf16.vlgmr.msrb.gmra.mxu2 %v2403_v57  ;;  %v2193_v57 = vld [vmem:[#allocation8 + $0x58] sm:$0xff] }
  0x99   :  { %1069 = vmatmul.bf16.vlgmr.msrb.gmra.mxu3 %v2408_v6  ;;  %v2427_v6 = vld [vmem:[#allocation7] sm:$0xf]  ;;  %1368 = vmatpush.bf16.msra.mxu2 %v2205_v45 }
  0x9a   :  { %v218_v34 = vperm.slane %v2427_v6, 0  ;;  %v219_v58 = vperm.slane %v2427_v6, 1  ;;  %1381 = vmatpush.bf16.msra.mxu3 %v2213_v12  ;;  %v220_v20 = vperm.slane %v2427_v6, 2 }
  0x9b   :  { %1343 = vmatpush.bf16.msra.mxu0 %v2188_v26  ;;  %v2207_v26 = vld [vmem:[#allocation8 + $0xc8] sm:$0xff] }
  0x9c   :  { %1356 = vmatpush.bf16.msra.mxu1 %v2196_v29 }
  0x9d   :  { %1369 = vmatpush.bf16.msra.mxu2 %v2204_v49 }
  0x9e   :  { %1382 = vmatpush.bf16.msra.mxu3 %v2212_v14 }
  0x9f   :  { %1344 = vmatpush.bf16.msra.mxu0 %v2187_v27 }
  0xa0   :  { %1357 = vmatpush.bf16.msra.mxu1 %v2195_v31 }
  0xa1   :  { %1370 = vmatpush.bf16.msra.mxu2 %v2203_v53 }
  0xa2   :  { %1383 = vmatpush.bf16.msra.mxu3 %v2211_v17 }
  0xa3   :  { %1345 = vmatpush.bf16.msra.mxu0 %v2186_v28 }
  0xa4   :  { %1358 = vmatpush.bf16.msra.mxu1 %v2194_v5 }
  0xa5   :  { %1371 = vmatpush.bf16.msra.mxu2 %v2202_v55  ;;  %v2223_v55 = vld [vmem:[%s2443_s4] ss:$0 sm:$0xff] }
  0xa6   :  { %1384 = vmatpush.bf16.msra.mxu3 %v2210_v18 }
  0xa7   :  { %1346 = vmatpush.bf16.msra.mxu0 %v2185_v30 }
  0xa8   :  { %1359 = vmatpush.bf16.msra.mxu1 %v2193_v57 }
  0xa9   :  { %1372 = vmatpush.bf16.msra.mxu2 %v2201_v56 }
  0xaa   :  { %1385 = vmatpush.bf16.msra.mxu3 %v2209_v19 }
  0xab   :  { %1347 = vmatpush.bf16.msra.mxu0 %v2184_v32  ;;  %v2206_v32 = vld [vmem:[#allocation8 + $0xc0] sm:$0xff] }
  0xac   :  { %1360 = vmatpush.bf16.msra.mxu1 %v2192_v35  ;;  %v221_v35 = vperm.slane %v2427_v6, 3 }
  0xad   :  { %1373 = vmatpush.bf16.msra.mxu2 %v2200_v62 }
  0xae   :  { %1386 = vmatpush.bf16.msra.mxu3 %v2208_v21 }
  0xaf   :  { %1348 = vmatpush.bf16.msra.mxu0 %v2183_v33 }
  0xb0   :  { %1361 = vmatpush.bf16.msra.mxu1 %v2191_v41 }
  0xb1   :  { %1374 = vmatpush.bf16.msra.mxu2 %v2199_v1 }
  0xb2   :  { %1387 = vmatpush.bf16.msra.mxu3 %v2207_v26 }
  0xb3   :  { %1349 = vmatpush.bf16.msra.mxu0 %v2182_v7 }
  0xb4   :  { %1362 = vmatpush.bf16.msra.mxu1 %v2190_v44 }
  0xb5   :  { %1375 = vmatpush.bf16.msra.mxu2 %v2198_v10 }
  0xb6   :  { %v875_v36 = vpop.f32.mrf.mxu0  ;;  %1388 = vmatpush.bf16.msra.mxu3 %v2206_v32 }
  0xb7   :  { %v876_v37 = vadd.f32 %v875_v36, %v218_v34  ;;  %v888_v38 = vpop.f32.mrf.mxu1 }
  0xb9   :  { %v889_v40 = vadd.f32 %v888_v38, %v876_v37 }
  0xbb   :  { %v901_v39 = vpop.f32.mrf.mxu2 }
  0xbc   :  { %v902_v42 = vadd.f32 %v901_v39, %v889_v40 }
  0xbe   :  { %v914_v43 = vpop.f32.mrf.mxu3  ;;  %v877_v47 = vpop.f32.mrf.mxu0 }
  0xbf   :  { %v915_v46 = vadd.f32 %v914_v43, %v902_v42  ;;  %v890_v48 = vpop.f32.mrf.mxu1 }
  0xc1   :  { %v1074_v50 = vmax.f32 %v915_v46, 0.0 }
  0xc3   :  { %v903_v51 = vpop.f32.mrf.mxu2  ;;  %v1078_v52 = vpack.c.bf16 %v1074_v50, %v1074_v50 }
  0xc5   :  { %1350 = vmatmul.bf16.vlgmr.msra.gmra.mxu0 %v1078_v52 }
  0xc6   :  { %v916_v54 = vpop.f32.mrf.mxu3 }
  0xd3   :  { %v927_v59 = vpop.f32.mrf.mxu0 }
  0xd4   :  { %v928_v60 = vadd.f32 %v927_v59, %v219_v58  ;;  %v940_v61 = vpop.f32.mrf.mxu1 }
  0xd6   :  { %v941_v63 = vadd.f32 %v940_v61, %v928_v60 }
  0xdb   :  { %v953_v0 = vpop.f32.mrf.mxu2  ;;  %v929_v8 = vpop.f32.mrf.mxu0 }
  0xdc   :  { %v954_v2 = vadd.f32 %v953_v0, %v941_v63  ;;  %v966_v3 = vpop.f32.mrf.mxu3  ;;  %v942_v9 = vpop.f32.mrf.mxu1 }
  0xde   :  { %v967_v4 = vadd.f32 %v966_v3, %v954_v2 }
  0xe0   :  { %v1075_v11 = vmax.f32 %v967_v4, 0.0 }
  0xe2   :  { %v1079_v13 = vpack.c.bf16 %v1075_v11, %v1075_v11 }
  0xe3   :  { %v955_v15 = vpop.f32.mrf.mxu2 }
  0xe4   :  { %1363 = vmatmul.bf16.vlgmr.msra.gmra.mxu1 %v1079_v13  ;;  %v968_v16 = vpop.f32.mrf.mxu3 }
  0xf3   :  { %v979_v22 = vpop.f32.mrf.mxu0 }
  0xf4   :  { %v980_v23 = vadd.f32 %v979_v22, %v220_v20  ;;  %v992_v24 = vpop.f32.mrf.mxu1 }
  0xf6   :  { %v993_v25 = vadd.f32 %v992_v24, %v980_v23 }
  0xfb   :  { %v1005_v27 = vpop.f32.mrf.mxu2  ;;  %v981_v31 = vpop.f32.mrf.mxu0 }
  0xfc   :  { %v1006_v28 = vadd.f32 %v1005_v27, %v993_v25  ;;  %v1018_v29 = vpop.f32.mrf.mxu3  ;;  %v994_v5 = vpop.f32.mrf.mxu1 }
  0xfe   :  { %v1019_v30 = vadd.f32 %v1018_v29, %v1006_v28 }
 0x100   :  { %v1076_v33 = vmax.f32 %v1019_v30, 0.0 }
 0x102   :  { %v1080_v57 = vpack.c.bf16 %v1076_v33, %v1076_v33 }
 0x103   :  { %v1007_v7 = vpop.f32.mrf.mxu2 }
 0x104   :  { %1376 = vmatmul.bf16.vlgmr.msra.gmra.mxu2 %v1080_v57  ;;  %v1020_v34 = vpop.f32.mrf.mxu3 }
 0x113   :  { %v1031_v36 = vpop.f32.mrf.mxu0 }
 0x114   :  { %v1032_v37 = vadd.f32 %v1031_v36, %v221_v35  ;;  %v1044_v38 = vpop.f32.mrf.mxu1 }
 0x116   :  { %v1045_v39 = vadd.f32 %v1044_v38, %v1032_v37 }
 0x11b   :  { %v1057_v40 = vpop.f32.mrf.mxu2  ;;  %v1033_v43 = vpop.f32.mrf.mxu0 }
 0x11c   :  { %v1058_v41 = vadd.f32 %v1057_v40, %v1045_v39  ;;  %v1070_v42 = vpop.f32.mrf.mxu3  ;;  %v1046_v44 = vpop.f32.mrf.mxu1 }
 0x11e   :  { %v1071_v45 = vadd.f32 %v1070_v42, %v1058_v41 }
 0x120   :  { %v1077_v46 = vmax.f32 %v1071_v45, 0.0 }
 0x122   :  { %v1081_v47 = vpack.c.bf16 %v1077_v46, %v1077_v46 }
 0x123   :  { %v1059_v48 = vpop.f32.mrf.mxu2 }
 0x124   :  { %v1072_v49 = vpop.f32.mrf.mxu3  ;;  %1389 = vmatmul.bf16.vlgmr.msra.gmra.mxu3 %v1081_v47 }
 0x142   :  { %v1351_v50 = vpop.f32.mrf.mxu0 }
 0x143   :  { %v1352_v56 = vadd.f32 %v2223_v55, %v1351_v50 }
 0x14a   :  { %v1353_v51 = vpop.f32.mrf.mxu0 }
 0x161   :  { %v1364_v52 = vpop.f32.mrf.mxu1 }
 0x162   :  { %v1365_v58 = vadd.f32 %v1364_v52, %v1352_v56 }
 0x169   :  { %v1366_v53 = vpop.f32.mrf.mxu1 }
 0x187   :  { %v1377_v6 = vpop.f32.mrf.mxu2 }
 0x188   :  { %v1378_v59 = vadd.f32 %v1377_v6, %v1365_v58 }
 0x18f   :  { %v1379_v54 = vpop.f32.mrf.mxu2 }
 0x1a7   :  { %v1390_v60 = vpop.f32.mrf.mxu3 }
 0x1a8   :  { %v1391_v61 = vadd.f32 %v1390_v60, %v1378_v59 }
 0x1aa   :  { %1394 = vst [vmem:[#allocation10] sm:$0xff] %v1391_v61 }
 0x1ab   :  { %1405 = dma.vmem_to_hbm [thread:$0]  %s1401_s16, 128, %s1403_s19, [#allocation4]  }
 0x1af   :  { %v1392_v62 = vpop.f32.mrf.mxu3 }
 0x1b0   :  { %2350 = dma.done.wait [#allocation4], 128  }
 0x1b1   :  { %2351 = vsyncadd [#allocation4], 4294967168 }
 0x1b2   :  { %1410 = vsyncpa [#allocation3], 1 }
 0x1b3   :  { %1411 = vsyncpa [#allocation6], 1 }
 0x1b4   :  { %1412 = vsyncpa [#allocation9], 1 }
 0x1b5   :  { %1413 = vsyncpa [#allocation4], 1 }

</bundles_post_ra>
